<compile_context>
chip_gen: v6e
topology: v6e:2x2x1
jax: 0.10.0
libtpu: 0.0.40
codegen_flags: <defaults>
</compile_context>

<pallas_src>
import jax
import jax.numpy as jnp
from jax.experimental import pallas as pl
from jax.experimental.pallas import tpu as pltpu


def siamese_mine_kernel(x1_ref, x2_ref, we_ref, be_ref, w12_ref, b12_ref,
                        out_ref, acc1_ref, acc2_ref):
    """One (batch-tile, K-tile) step of the SiameseNet_MINE forward pass.

    x1_ref/x2_ref : [tm, tk]   f32   flattened input tiles (cast to bf16 here)
    we_ref        : [tk, 256]  bf16  embedding Linear weight K-slice ([in, out])
    be_ref        : [1, 256]   f32   embedding Linear bias
    w12_ref       : [1, 256]   f32   folded fc2(fc1(.)) weight (row vector)
    b12_ref       : [1, 1]     f32   folded fc2(fc1(.)) bias
    out_ref       : [tm, 128]  f32   sigmoid score broadcast across lanes
    acc1/acc2     : [tm, 256]  f32   VMEM accumulators for x1 @ We / x2 @ We
    """
    k = pl.program_id(1)

    @pl.when(k == 0)
    def _init():
        acc1_ref[...] = jnp.zeros_like(acc1_ref)
        acc2_ref[...] = jnp.zeros_like(acc2_ref)

    w = we_ref[...]                               # resident bf16 K-slice
    # In-kernel f32->bf16 cast rides otherwise-idle VPU slots in a DMA-bound
    # kernel and avoids a wrapper-side cast round trip through HBM.
    x1 = x1_ref[...].astype(jnp.bfloat16)
    x2 = x2_ref[...].astype(jnp.bfloat16)
    # Two MXU passes against the same resident RHS (no [2*tm, tk] concat copy).
    acc1_ref[...] += jnp.dot(x1, w, preferred_element_type=jnp.float32)
    acc2_ref[...] += jnp.dot(x2, w, preferred_element_type=jnp.float32)

    @pl.when(k == pl.num_programs(1) - 1)
    def _finalize():
        be = be_ref[...]
        e1 = jnp.maximum(acc1_ref[...] + be, 0.0)     # f32 epilogue (v5e-safe)
        e2 = jnp.maximum(acc2_ref[...] + be, 0.0)
        diff = e1 - e2
        d = diff * diff       # torch.abs((.)**2): abs is redundant on a square

        # fc2(fc1(d)) with no intervening nonlinearity == one 256->1 linear
        # map; N=1 on the MXU wastes 255/256 columns, so do it as a VPU
        # multiply + cross-lane (XLU) reduce on otherwise-idle slots.
        o = jnp.sum(d * w12_ref[...], axis=-1, keepdims=True) + b12_ref[...]
        s = jax.nn.sigmoid(o)

        # Lane-dense store (last dim 128); column 0 is sliced in the wrapper.
        # TODO(synk): could pack scores into (tm//128, 128) to cut writeback
        # 128x, but output bytes are negligible next to the D-sized input
        # traffic for any realistic D.
        out_ref[...] = jnp.broadcast_to(s, out_ref.shape)


def _round_up(n, m):
    return ((n + m - 1) // m) * m


def siamese_mine_forward(x1, x2, params, *, block_rows=512, block_k=512):
    """x1, x2: [B, C, H, W] float32 (NCHW, like the PyTorch module)."""
    B = x1.shape[0]
    D = 1
    for s in x1.shape[1:]:
        D *= int(s)

    we, be, w1, b1, w2, b2 = params
    emb = we.shape[1]            # 256

    # Fold fc1 (256->128) and fc2 (128->1): exact, since the reference module
    # applies no nonlinearity between them.
    w12_row = (w1 @ w2).T        # [1, 256]
    b12 = b1 @ w2 + b2           # [1, 1]

    # --- tiling -----------------------------------------------------------
    # Batch tile: multiple of 8 sublanes; capped so the parallel grid axis has
    # at least 2 steps (keeps both v7x TensorCores busy even at tiny B).
    tm = min(block_rows, _round_up(-(-B // 2), 8))
    tm = max(8, _round_up(tm, 8))
    b_pad = _round_up(B, tm)
    if b_pad // tm < 2:
        b_pad = 2 * tm

    # K tile over the flattened input dim: lane-aligned, divides padded D.
    d_pad = _round_up(D, 128)
    tk = _round_up(min(block_k, d_pad), 128)
    d_pad = _round_up(d_pad, tk)

    # Inputs stay f32 in HBM (cast to bf16 in-kernel); only the embedding
    # weight is cast once here. Zero padding is exact (padded rows/cols of x
    # and padded K-rows of we contribute nothing to the matmul).
    x1f = x1.reshape(B, D)
    x2f = x2.reshape(B, D)
    if (b_pad, d_pad) != (B, D):
        pad = ((0, b_pad - B), (0, d_pad - D))
        x1f = jnp.pad(x1f, pad)
        x2f = jnp.pad(x2f, pad)
    we_bf = we.astype(jnp.bfloat16)
    if d_pad != D:
        we_bf = jnp.pad(we_bf, ((0, d_pad - D), (0, 0)))

    grid = (b_pad // tm, d_pad // tk)

    # Explicit scoped-VMEM budget (double-buffered inputs/output + scratch),
    # with headroom; capped at 64 MiB so the same tiling stays v7x-safe.
    vmem_needed = (
        2 * 2 * tm * tk * 4          # x1/x2 f32 tiles, double-buffered
        + 2 * tk * emb * 2           # we bf16 K-slice, double-buffered
        + 2 * tm * 128 * 4           # output tile, double-buffered
        + 2 * tm * emb * 4           # f32 accumulator scratch
        + 4 * 2 * emb * 4            # be / w12 / b12 (generous)
    )
    vmem_limit = min(64 * 1024 * 1024,
                     max(32 * 1024 * 1024, (vmem_needed * 3) // 2))

    cost = pl.CostEstimate(
        flops=2 * 2 * b_pad * d_pad * emb + 10 * b_pad * emb,
        transcendentals=b_pad,
        bytes_accessed=(2 * b_pad * d_pad) * 4                 # x1, x2 (f32)
                       + (b_pad // tm) * d_pad * emb * 2       # we per batch tile
                       + (2 * emb + 1) * 4                     # biases + folded fc
                       + b_pad * 128 * 4,                      # lane-padded output
    )

    out = pl.pallas_call(
        siamese_mine_kernel,
        out_shape=jax.ShapeDtypeStruct((b_pad, 128), jnp.float32),
        grid=grid,
        in_specs=[
            pl.BlockSpec((tm, tk), lambda i, k: (i, k)),       # x1 tile
            pl.BlockSpec((tm, tk), lambda i, k: (i, k)),       # x2 tile
            pl.BlockSpec((tk, emb), lambda i, k: (k, 0)),      # we K-slice
            pl.BlockSpec((1, emb), lambda i, k: (0, 0)),       # be
            pl.BlockSpec((1, emb), lambda i, k: (0, 0)),       # w12 row
            pl.BlockSpec((1, 1), lambda i, k: (0, 0)),         # b12
        ],
        out_specs=pl.BlockSpec((tm, 128), lambda i, k: (i, 0)),
        scratch_shapes=[pltpu.VMEM((tm, emb), jnp.float32),
                        pltpu.VMEM((tm, emb), jnp.float32)],
        compiler_params=pltpu.CompilerParams(
            dimension_semantics=("parallel", "arbitrary"),
            vmem_limit_bytes=vmem_limit,
        ),
        cost_estimate=cost,
    )(x1f, x2f, we_bf, be, w12_row, b12)

    return out[:B, 0:1]


def init_params(key, in_dim, emb_dim=256, hid_dim=128):
    """Deterministic synthetic parameter init (PyTorch-Linear-like scale)."""
    ks = jax.random.split(key, 6)

    def lin(kw, kb, fan_in, fan_out):
        bound = 1.0 / jnp.sqrt(float(fan_in))
        # stored as [in, out] (already transposed vs. torch's [out, in])
        w = jax.random.uniform(kw, (fan_in, fan_out), jnp.float32, -bound, bound)
        b = jax.random.uniform(kb, (1, fan_out), jnp.float32, -bound, bound)
        return w, b

    we, be = lin(ks[0], ks[1], in_dim, emb_dim)   # embedding_net Linear
    w1, b1 = lin(ks[2], ks[3], emb_dim, hid_dim)  # fc1: 256 -> 128
    w2, b2 = lin(ks[4], ks[5], hid_dim, 1)        # fc2: 128 -> 1
    return (we, be, w1, b1, w2, b2)


def reference_forward(x1, x2, params):
    """Pure-JAX f32 reference matching the PyTorch semantics."""
    we, be, w1, b1, w2, b2 = params
    B = x1.shape[0]
    x1f = x1.reshape(B, -1)
    x2f = x2.reshape(B, -1)
    e1 = jnp.maximum(x1f @ we + be, 0.0)
    e2 = jnp.maximum(x2f @ we + be, 0.0)
    d = jnp.abs((e1 - e2) ** 2)
    h = d @ w1 + b1
    o = h @ w2 + b2
    return jax.nn.sigmoid(o)


if __name__ == "__main__":
    key = jax.random.PRNGKey(0)
    k_x1, k_x2, k_p = jax.random.split(key, 3)

    B, C, H, W = 8, 4, 16, 16          # small NCHW inputs
    x1 = jax.random.normal(k_x1, (B, C, H, W), jnp.float32)
    x2 = jax.random.normal(k_x2, (B, C, H, W), jnp.float32)

    params = init_params(k_p, C * H * W)

    scores = siamese_mine_forward(x1, x2, params)
    scores = jax.block_until_ready(scores)

    ref = reference_forward(x1, x2, params)
    assert scores.shape == (B, 1)
    # bf16 weight + bf16-cast inputs with f32 accumulation -> looser tolerance.
    err = float(jnp.max(jnp.abs(scores - ref)))
    assert err < 3e-2, err

    print("KERNEL_OK")
</pallas_src>

<mosaic_0001>
module attributes {stable_mosaic.version = 11 : i64} {
  func.func @siamese_mine_kernel(%arg0: i32, %arg1: i32, %arg2: memref<8x512xf32, #tpu.memory_space<vmem>>, %arg3: memref<8x512xf32, #tpu.memory_space<vmem>>, %arg4: memref<512x256xbf16, #tpu.memory_space<vmem>>, %arg5: memref<1x256xf32, #tpu.memory_space<vmem>>, %arg6: memref<1x256xf32, #tpu.memory_space<vmem>>, %arg7: memref<1x1xf32, #tpu.memory_space<vmem>>, %arg8: memref<8x128xf32, #tpu.memory_space<vmem>>, %arg9: memref<8x256xf32, #tpu.memory_space<vmem>>, %arg10: memref<8x256xf32, #tpu.memory_space<vmem>>) attributes {dimension_semantics = [#tpu.dimension_semantics<parallel>, #tpu.dimension_semantics<arbitrary>], iteration_bounds = array<i64: 2, 2>, scalar_prefetch = 0 : i64, scratch_operands = 2 : i64, tpu.core_type = #tpu.core_type<tc>, window_params = [{transform_indices = @transform_0, window_bounds = array<i64: 8, 512>}, {transform_indices = @transform_1, window_bounds = array<i64: 8, 512>}, {transform_indices = @transform_2, window_bounds = array<i64: 512, 256>}, {pipeline_mode = #tpu.pipeline_mode<synchronous>, transform_indices = @transform_3, window_bounds = array<i64: 1, 256>}, {pipeline_mode = #tpu.pipeline_mode<synchronous>, transform_indices = @transform_4, window_bounds = array<i64: 1, 256>}, {pipeline_mode = #tpu.pipeline_mode<synchronous>, transform_indices = @transform_5, window_bounds = array<i64: 1, 1>}, {transform_indices = @transform_6, window_bounds = array<i64: 8, 128>}]} {
    %c0_i32 = arith.constant 0 : i32
    %0 = arith.cmpi eq, %arg1, %c0_i32 : i32
    %1 = arith.extui %0 : i1 to i32
    %c0_i32_0 = arith.constant 0 : i32
    %2 = arith.cmpi ne, %1, %c0_i32_0 : i32
    scf.if %2 {
      %cst_16 = arith.constant 0.000000e+00 : f32
      %19 = vector.broadcast %cst_16 : f32 to vector<8x256xf32>
      %c0_17 = arith.constant 0 : index
      %c0_18 = arith.constant 0 : index
      %20 = vector.load %arg9[%c0_17, %c0_18] : memref<8x256xf32, #tpu.memory_space<vmem>>, vector<8x256xf32>
      tpu.vector_store %arg9[%c0_17, %c0_18], %19 {strides = array<i32>} : memref<8x256xf32, #tpu.memory_space<vmem>>, vector<8x256xf32>,
      %cst_19 = arith.constant 0.000000e+00 : f32
      %21 = vector.broadcast %cst_19 : f32 to vector<8x256xf32>
      %c0_20 = arith.constant 0 : index
      %c0_21 = arith.constant 0 : index
      %22 = vector.load %arg10[%c0_20, %c0_21] : memref<8x256xf32, #tpu.memory_space<vmem>>, vector<8x256xf32>
      tpu.vector_store %arg10[%c0_20, %c0_21], %21 {strides = array<i32>} : memref<8x256xf32, #tpu.memory_space<vmem>>, vector<8x256xf32>,
    } else {
    }
    %c0 = arith.constant 0 : index
    %c0_1 = arith.constant 0 : index
    %3 = vector.load %arg4[%c0, %c0_1] : memref<512x256xbf16, #tpu.memory_space<vmem>>, vector<512x256xbf16>
    %c0_2 = arith.constant 0 : index
    %c0_3 = arith.constant 0 : index
    %4 = vector.load %arg2[%c0_2, %c0_3] : memref<8x512xf32, #tpu.memory_space<vmem>>, vector<8x512xf32>
    %5 = arith.truncf %4 : vector<8x512xf32> to vector<8x512xbf16>
    %c0_4 = arith.constant 0 : index
    %c0_5 = arith.constant 0 : index
    %6 = vector.load %arg3[%c0_4, %c0_5] : memref<8x512xf32, #tpu.memory_space<vmem>>, vector<8x512xf32>
    %7 = arith.truncf %6 : vector<8x512xf32> to vector<8x512xbf16>
    %c0_6 = arith.constant 0 : index
    %c0_7 = arith.constant 0 : index
    %8 = vector.load %arg9[%c0_6, %c0_7] : memref<8x256xf32, #tpu.memory_space<vmem>>, vector<8x256xf32>
    %cst = arith.constant dense<0.000000e+00> : vector<8x256xf32>
    %9 = tpu.matmul %5, %3, %cst {dimension_numbers = #tpu.dot_dimension_numbers<[1], [0], [0], [1], [0, 0, 1, 1], [], []>} : vector<8x512xbf16>, vector<512x256xbf16>, vector<8x256xf32> -> vector<8x256xf32>
    %10 = arith.addf %8, %9 : vector<8x256xf32>
    %c0_8 = arith.constant 0 : index
    %c0_9 = arith.constant 0 : index
    %11 = vector.load %arg9[%c0_8, %c0_9] : memref<8x256xf32, #tpu.memory_space<vmem>>, vector<8x256xf32>
    tpu.vector_store %arg9[%c0_8, %c0_9], %10 {strides = array<i32>} : memref<8x256xf32, #tpu.memory_space<vmem>>, vector<8x256xf32>,
    %c0_10 = arith.constant 0 : index
    %c0_11 = arith.constant 0 : index
    %12 = vector.load %arg10[%c0_10, %c0_11] : memref<8x256xf32, #tpu.memory_space<vmem>>, vector<8x256xf32>
    %cst_12 = arith.constant dense<0.000000e+00> : vector<8x256xf32>
    %13 = tpu.matmul %7, %3, %cst_12 {dimension_numbers = #tpu.dot_dimension_numbers<[1], [0], [0], [1], [0, 0, 1, 1], [], []>} : vector<8x512xbf16>, vector<512x256xbf16>, vector<8x256xf32> -> vector<8x256xf32>
    %14 = arith.addf %12, %13 : vector<8x256xf32>
    %c0_13 = arith.constant 0 : index
    %c0_14 = arith.constant 0 : index
    %15 = vector.load %arg10[%c0_13, %c0_14] : memref<8x256xf32, #tpu.memory_space<vmem>>, vector<8x256xf32>
    tpu.vector_store %arg10[%c0_13, %c0_14], %14 {strides = array<i32>} : memref<8x256xf32, #tpu.memory_space<vmem>>, vector<8x256xf32>,
    %c1_i32 = arith.constant 1 : i32
    %16 = arith.cmpi eq, %arg1, %c1_i32 : i32
    %17 = arith.extui %16 : i1 to i32
    %c0_i32_15 = arith.constant 0 : i32
    %18 = arith.cmpi ne, %17, %c0_i32_15 : i32
    scf.if %18 {
      %c0_16 = arith.constant 0 : index
      %c0_17 = arith.constant 0 : index
      %19 = vector.load %arg5[%c0_16, %c0_17] : memref<1x256xf32, #tpu.memory_space<vmem>>, vector<1x256xf32>
      %c0_18 = arith.constant 0 : index
      %c0_19 = arith.constant 0 : index
      %20 = vector.load %arg9[%c0_18, %c0_19] : memref<8x256xf32, #tpu.memory_space<vmem>>, vector<8x256xf32>
      %21 = vector.broadcast %19 : vector<1x256xf32> to vector<8x256xf32>
      %22 = arith.addf %20, %21 : vector<8x256xf32>
      %cst_20 = arith.constant 0.000000e+00 : f32
      %23 = vector.broadcast %cst_20 : f32 to vector<8x256xf32>
      %24 = arith.maximumf %22, %23 : vector<8x256xf32>
      %c0_21 = arith.constant 0 : index
      %c0_22 = arith.constant 0 : index
      %25 = vector.load %arg10[%c0_21, %c0_22] : memref<8x256xf32, #tpu.memory_space<vmem>>, vector<8x256xf32>
      %26 = vector.broadcast %19 : vector<1x256xf32> to vector<8x256xf32>
      %27 = arith.addf %25, %26 : vector<8x256xf32>
      %cst_23 = arith.constant 0.000000e+00 : f32
      %28 = vector.broadcast %cst_23 : f32 to vector<8x256xf32>
      %29 = arith.maximumf %27, %28 : vector<8x256xf32>
      %30 = arith.subf %24, %29 : vector<8x256xf32>
      %31 = arith.mulf %30, %30 : vector<8x256xf32>
      %c0_24 = arith.constant 0 : index
      %c0_25 = arith.constant 0 : index
      %32 = vector.load %arg6[%c0_24, %c0_25] : memref<1x256xf32, #tpu.memory_space<vmem>>, vector<1x256xf32>
      %33 = vector.broadcast %32 : vector<1x256xf32> to vector<8x256xf32>
      %34 = arith.mulf %31, %33 : vector<8x256xf32>
      %cst_26 = arith.constant dense<0.000000e+00> : vector<8xf32>
      %35 = vector.multi_reduction <add>, %34, %cst_26 [1] : vector<8x256xf32> to vector<8xf32>
      %36 = vector.shape_cast %35 : vector<8xf32> to vector<8x1xf32>
      %c0_27 = arith.constant 0 : index
      %c0_28 = arith.constant 0 : index
      %37 = vector.load %arg7[%c0_27, %c0_28] : memref<1x1xf32, #tpu.memory_space<vmem>>, vector<1x1xf32>
      %38 = vector.broadcast %37 : vector<1x1xf32> to vector<8x1xf32>
      %39 = arith.addf %36, %38 : vector<8x1xf32>
      %40 = arith.negf %39 : vector<8x1xf32>
      %41 = math.exp %40 : vector<8x1xf32>
      %cst_29 = arith.constant 1.000000e+00 : f32
      %42 = vector.broadcast %cst_29 : f32 to vector<8x1xf32>
      %43 = arith.addf %42, %41 : vector<8x1xf32>
      %44 = arith.divf %42, %43 : vector<8x1xf32>
      %45 = vector.shape_cast %44 : vector<8x1xf32> to vector<8x1xf32>
      %46 = vector.broadcast %45 : vector<8x1xf32> to vector<8x128xf32>
      %c0_30 = arith.constant 0 : index
      %c0_31 = arith.constant 0 : index
      %47 = vector.load %arg8[%c0_30, %c0_31] : memref<8x128xf32, #tpu.memory_space<vmem>>, vector<8x128xf32>
      tpu.vector_store %arg8[%c0_30, %c0_31], %46 {strides = array<i32>} : memref<8x128xf32, #tpu.memory_space<vmem>>, vector<8x128xf32>,
    } else {
    }
    return
  }
  func.func @transform_0(%arg0: i32, %arg1: i32) -> (i32, i32) {
    %c0_i32 = arith.constant 0 : i32
    return %arg0, %arg1 : i32, i32
  }
  func.func @transform_1(%arg0: i32, %arg1: i32) -> (i32, i32) {
    %c0_i32 = arith.constant 0 : i32
    return %arg0, %arg1 : i32, i32
  }
  func.func @transform_2(%arg0: i32, %arg1: i32) -> (i32, i32) {
    %c0_i32 = arith.constant 0 : i32
    %c0_i32_0 = arith.constant 0 : i32
    return %arg1, %c0_i32 : i32, i32
  }
  func.func @transform_3(%arg0: i32, %arg1: i32) -> (i32, i32) {
    %c0_i32 = arith.constant 0 : i32
    %c0_i32_0 = arith.constant 0 : i32
    %c0_i32_1 = arith.constant 0 : i32
    return %c0_i32, %c0_i32_0 : i32, i32
  }
  func.func @transform_4(%arg0: i32, %arg1: i32) -> (i32, i32) {
    %c0_i32 = arith.constant 0 : i32
    %c0_i32_0 = arith.constant 0 : i32
    %c0_i32_1 = arith.constant 0 : i32
    return %c0_i32, %c0_i32_0 : i32, i32
  }
  func.func @transform_5(%arg0: i32, %arg1: i32) -> (i32, i32) {
    %c0_i32 = arith.constant 0 : i32
    %c0_i32_0 = arith.constant 0 : i32
    %c0_i32_1 = arith.constant 0 : i32
    return %c0_i32, %c0_i32_0 : i32, i32
  }
  func.func @transform_6(%arg0: i32, %arg1: i32) -> (i32, i32) {
    %c0_i32 = arith.constant 0 : i32
    %c0_i32_0 = arith.constant 0 : i32
    return %arg0, %c0_i32 : i32, i32
  }
}

</mosaic_0001>

<bundles_post_ra>
// kernel: tpu_custom_call.1
= control target key start
LH: loop header
LB: loop body
LE: loop exit
PB: predicated region body
PF: predicated region fallthrough
CT: control target
= control target key end

     0   :  { %s2434_s0 = inlined_call_operand.hbm [shape: f32[16,1024], index: 0, kind: input, shape index: {}]   ;;  %s2435_s1 = inlined_call_operand.hbm [shape: f32[16,1024], index: 1, kind: input, shape index: {}]   ;;  %s2436_s2 = inlined_call_operand.hbm [shape: bf16[1024,256], index: 2, kind: input, shape index: {}]   ;;  %s2437_s3 = inlined_call_operand.vmem [shape: f32[1,256], index: 3, kind: input, shape index: {}]   ;;  %s2438_s4 = inlined_call_operand.vmem [shape: f32[1,256], index: 4, kind: input, shape index: {}]   ;;  %s2439_s5 = inlined_call_operand.<no memory space> [shape: f32[1,1], index: 5, kind: input, shape index: {}]   ;;  %s2440_s6 = inlined_call_operand.hbm [shape: f32[16,128], index: 6, kind: output, shape index: {}]  }
   0x1   :  { %2462 = sst [smem:[#allocation36_spill]] %s2435_s1  ;;  %v11_v0 = vstv %s2439_s5 }
   0x2   :  { %2463 = sst [smem:[#allocation37_spill]] %s2438_s4  ;;  %12 = vst [vmem:[#allocation4] sm:$0x1] %v11_v0 }
   0x3   :  { %2464 = sst [smem:[#allocation38_spill]] %s2440_s6 }
   0x4   :  { %13 = vsyncpa [#allocation6], 0 }
   0x5   :  { %15 = vsyncpa [#allocation6 + $0x1], 0 }
   0x6   :  { %16 = vsyncpa [#allocation9], 0 }
   0x7   :  { %18 = vsyncpa [#allocation9 + $0x1], 0 }
   0x8   :  { %19 = vsyncpa [#allocation7], 0 }
   0x9   :  { %21 = vsyncpa [#allocation7 + $0x1], 0  ;;  %s1786_s23 = smov 0   ;;  %s1788_s24 = smov 0  }
   0xa   :  { %s1790_s25 = smov 0   ;;  %s1792_s26 = smov 0  }
   0xb   :  { %s1794_s27 = smov 0   ;;  %s1796_s28 = smov 0  }
   0xc   :  { %s1798_s5 = smov 0   ;;  %s1800_s29 = smov 0  }
   0xd   :  { %s1802_s30 = smov 0   ;;  %s1804_s7 = smov 0  }
   0xe   :  { %s1806_s8 = smov 0   ;;  %s1808_s9 = smov 0  }
   0xf   :  { %s1810_s10 = smov 0   ;;  %s1812_s11 = smov 0  }
  0x10 LB: > { %2465 = sst [smem:[#allocation16_spill]] %s1686_s23  ;;  %s1855_s12 = sadd.s32 4294967295, %s1738_s11   ;;  %s1738_s11 = sphi %s1812_s11, %s27_s11   ;;  %s1734_s10 = sphi %s1810_s10, %s2521_s10   ;;  %s1730_s9 = sphi %s1808_s9, %s2532_s9   ;;  %s1726_s8 = sphi %s1806_s8, %s2519_s8   ;;  %s1722_s7 = sphi %s1804_s7, %s2531_s7   ;;  %s1718_s30 = sphi %s1802_s30, %s2530_s30   ;;  %s1714_s29 = sphi %s1800_s29, %s2529_s29   ;;  %s1710_s5 = sphi %s1798_s5, %s2528_s5   ;;  %s1706_s28 = sphi %s1796_s28, %s2527_s28   ;;  %s1702_s27 = sphi %s1794_s27, %s2526_s27   ;;  %s1698_s26 = sphi %s1792_s26, %s2525_s26   ;;  %s1694_s25 = sphi %s1790_s25, %s2516_s25   ;;  %s1690_s24 = sphi %s1788_s24, %s2524_s24   ;;  %s1686_s23 = sphi %s1786_s23, %s2523_s23  }
  0x11   : > { %2466 = sst [smem:[#allocation17_spill]] %s1694_s25  ;;  %s36_s14 = sadd.s32 1, %s1730_s9 }
  0x12   : > { %2467 = sst [smem:[#allocation18_spill]] %s1726_s8  ;;  %s39_s15 = sadd.s32 1, %s1734_s10 }
  0x13   : > { %2468 = sst [smem:[#allocation19_spill]] %s1734_s10  ;;  %p37_p0 = scmp.ge.s32.totalorder %s36_s14, 2 }
  0x14   : > { %2469 = sst [smem:[#allocation20_spill]] %s1738_s11  ;;  %s48_s16 = sadd.s32 1, %s1718_s30 }
  0x15   : > { %p55_p1 = scmp.ne.s32.totalorder %s1718_s30, %s1714_s29  ;;  %p56_p2 = scmp.eq.s32.totalorder %s1738_s11, 0 }
  0x16   : > { %s2534_s14 = smov (%p37_p0, %s36_s14), 0  ;;  %s2536_s15 = smov (!%p37_p0, %s39_s15), %s1734_s10 }
  0x17   : > { %2470 = sst [smem:[#allocation21_spill]] %s2534_s14  ;;  %s44_s17 = ssub.s32 %s1730_s9, %s2534_s14 }
  0x18   : > { %p1871_p3 = por %p56_p2, %p55_p1  ;;  %p41_p4 = scmp.ge.s32.totalorder %s2536_s15, 2 }
  0x19   : > { %p61_p5 = scmp.ne.s32.totalorder %s1714_s29, %s1710_s5  ;;  %p62_p6 = scmp.eq.s32.totalorder %s1855_s12, 0 }
  0x1a   : > { %p100_p7 = scmp.eq.s32.totalorder %s44_s17, 0  ;;  %s2538_s15 = smov (%p41_p4, %s2536_s15), 0 }
  0x1b   : > { %2472 = sst [smem:[#allocation22_spill]] %s2538_s15  ;;  %p1881_p8 = por %p62_p6, %p61_p5 }
  0x1c   : > { %s102_s20 = sadd.s32 1, %s1706_s28  ;;  %s43_s21 = ssub.s32 %s1734_s10, %s2538_s15 }
  0x1d   : > { %p109_p9 = scmp.ne.s32.totalorder %s1706_s28, %s1702_s27  ;;  %s45_s22 = sor.u32 %s44_s17, %s43_s21 }
  0x1e   : > { %p115_p10 = scmp.ne.s32.totalorder %s1702_s27, %s1698_s26  ;;  %p46_p11 = scmp.eq.s32.totalorder %s45_s22, 0 }
  0x1f   : > { %p1894_p12 = por %p109_p9, %p56_p2  ;;  %p189_p0 = scmp.eq.s32.totalorder %s43_s21, 0 }
  0x20   : > { %s1899_s13 = scalar_select %p100_p7, %s1706_s28, %s102_s20  }
  0x21   : > { %s1902_s14 = scalar_select %p46_p11, %s1718_s30, %s48_s16  }
  0x22   : > { %2475 = sst [smem:[#allocation23_spill]] %s1899_s13  ;;  %p1906_p13 = por %p115_p10, %p62_p6 }
  0x23   : > { %2476 = sst [smem:[#allocation24_spill]] %s1902_s14  ;;  %s191_s26 = sadd.s32 1, %s1694_s25 }
  0x24   : > { %p201_p1 = scmp.ne.s32.totalorder %s1694_s25, %s1690_s24  ;;  %p202_p2 = scmp.eq.s32.totalorder %s1855_s12, 3 }
  0x25   : > { %s1914_s22 = scalar_select %p189_p0, %s1694_s25, %s191_s26  }
  0x26   : > { %p207_p4 = scmp.ne.s32.totalorder %s1690_s24, %s1686_s23  ;;  %s2479_s20 = sadd.s32 4294967294, %s1738_s11  }
  0x27   : > { %2478 = sst [smem:[#allocation25_spill]] %s1914_s22  ;;  %p208_p5 = scmp.eq.s32.totalorder %s2479_s20, 3 }
  0x28   : > { %p1921_p7 = por %p202_p2, %p201_p1  ;;  %p1283_p6 = scmp.lt.s32.totalorder %s1738_s11, 4 }
  0x29   : > { %p1926_p9 = por %p208_p5, %p207_p4  ;;  %s2449_s21 = sand.u32 1, %s1718_s30  }
  0x2a   : > { %s2480_s16 = scalar_select %p1921_p7, 1, 0 }
  0x2b   : > { %s2482_s15 = scalar_select %p1926_p9, 1, 0 }
  0x2c   : > { %2481 = sst [smem:[#allocation26_spill]] %s2480_s16  ;;  %s1933_s14 = sshll.u32 %s2449_s21, 5 }
  0x2d   : > { %2483 = sst [smem:[#allocation27_spill]] %s2482_s15  ;;  %s1171_s26 = sshll.u32 %s1730_s9, 2 }
  0x2e   : > { %s1172_s13 = sshll.u32 %s1734_s10, 3  ;;  %p1941_p10 = pnand %p1283_p6, %p1871_p3 }
  0x2f   : > { %s247_s22 = sadd.s32 %s1172_s13, %s1171_s26  ;;  %s258_s25 = sand.u32 1, %s1738_s11  }
  0x30   : > { %s1173_s23 = sshll.u32 %s247_s22, 7  ;;  %s2485_s1 = sld [smem:[#allocation36_spill]] }
  0x31   : > { %s262_s21 = scalar_lea.vmem [#allocation8], %s1933_s14  ;;  %p1954_p11 = pnand %p1283_p6, %p1894_p12 }
  0x32   : > { %s272_s8 = sshll.u32 %s262_s21, 4  ;;  %s1958_s10 = scalar_lea.sflag [#allocation9], %s258_s25  ;;  %s273_s8 = int_to_ptr.vmem [resolvable:$true] %s272_s8 }
  0x33   : > { %p2451_p3 = pneg %p1941_p10  ;;  %s1515_s13 = scalar_lea.vmem %s273_s8, 512 }
  0x34   : > { %p1516_p0 = scmp.ne.s32.totalorder %s273_s8, %s1515_s13  ;;  %s1740_s6 = smov [#allocation8]  }
  0x35   : > { %s1520_s15 = sshll.u32 %s1740_s6, 4  ;;  %s1521_s15 = int_to_ptr.vmem [resolvable:$false] %s1520_s15 }
  0x36   : > { %s270_s16 = scalar_lea.hbm %s2485_s1, %s1173_s23  ;;  %p1518_p1 = pnand %p1516_p0, %p2451_p3 }
  0x37   : > { %s1522_s22 = scalar_lea.vmem %s1521_s15, 1024  ;;  %p1523_p4 = scmp.lt.s32.totalorder %s273_s8, %s1521_s15 }
  0x38   : > { %p1519_p2 = pneg %p1518_p1  ;;  %p1524_p5 = scmp.lt.s32.totalorder %s1522_s22, %s1515_s13 }
  0x3a   : > { %p1525_p12 = por %p1524_p5, %p1523_p4 }
  0x3c   : > { %p1526_p6 = pnand %p1525_p12, %p1519_p2 }
  0x3e   : > { %1529 = shalt.err (!%p1526_p6)
}
  0x3f   : > { %1275 = dma.hbm_to_vmem [thread:$0]  (!%p1941_p10), %s270_s16, 512, %s273_s8, %s1958_s10  }
  0x40   : > { %p1182_p0 = scmp.ge.s32.totalorder %s1738_s11, 1  ;;  %p299_p1 = scmp.lt.s32.totalorder %s1738_s11, 5 }
  0x41   : > { %s249_s26 = scalar_lea.hbm %s2434_s0, %s1173_s23  ;;  %s241_s13 = scalar_lea.vmem [#allocation5], %s1933_s14 }
  0x42   : > { %p1970_p3 = pnand %p1182_p0, %p299_p1  ;;  %s251_s6 = sshll.u32 %s241_s13, 4  ;;  %s252_s6 = int_to_ptr.vmem [resolvable:$true] %s251_s6 }
  0x43   : > { %s281_s15 = sand.u32 1, %s1706_s28   ;;  %s2488_s22 = sand.u32 1, %s1718_s30  }
  0x44   : > { %s238_s1 = scalar_lea.sflag [#allocation6], %s2488_s22  ;;  %s1543_s4 = scalar_lea.vmem %s252_s6, 512 }
  0x45   : > { %p1544_p2 = scmp.ne.s32.totalorder %s252_s6, %s1543_s4  ;;  %p2489_p4 = pneg %p1941_p10 }
  0x46   : > { %s1741_s8 = smov [#allocation5]  }
  0x47   : > { %p1546_p5 = pnand %p1544_p2, %p2489_p4  ;;  %s1548_s16 = sshll.u32 %s1741_s8, 4  ;;  %s1549_s16 = int_to_ptr.vmem [resolvable:$false] %s1548_s16 }
  0x48   : > { %s1550_s11 = scalar_lea.vmem %s1549_s16, 1024  ;;  %p1551_p6 = scmp.lt.s32.totalorder %s252_s6, %s1549_s16 }
  0x49   : > { %p1547_p12 = pneg %p1546_p5  ;;  %p1552_p0 = scmp.lt.s32.totalorder %s1550_s11, %s1543_s4 }
  0x4b   : > { %p1553_p1 = por %p1552_p0, %p1551_p6 }
  0x4d   : > { %p1554_p9 = pnand %p1553_p1, %p1547_p12 }
  0x4f   : > { %1557 = shalt.err (!%p1554_p9)
}
  0x50   : > { %1272 = dma.hbm_to_vmem [thread:$0]  (!%p1941_p10), %s249_s26, 512, %s252_s6, %s238_s1  }
  0x51   : > { %s1178_s23 = sshll.u32 %s281_s15, 9  ;;  %s1260_s14 = sshll.u32 %s1730_s9, 13 }
  0x52   : > { %s290_s13 = scalar_lea.hbm %s2436_s2, %s1260_s14  ;;  %s283_s22 = scalar_lea.vmem [#allocation10], %s1178_s23 }
  0x53   : > { %s291_s8 = sshll.u32 %s283_s22, 4  ;;  %p1560_p2 = pneg %p1954_p11  ;;  %s292_s8 = int_to_ptr.vmem [resolvable:$true] %s291_s8 }
  0x54   : > { %s1571_s4 = scalar_lea.vmem %s292_s8, 8192  ;;  %s1742_s11 = smov [#allocation10]  }
  0x55   : > { %p1572_p4 = scmp.ne.s32.totalorder %s292_s8, %s1571_s4  ;;  %s1576_s20 = sshll.u32 %s1742_s11, 4  ;;  %s1577_s20 = int_to_ptr.vmem [resolvable:$false] %s1576_s20 }
  0x56   : > { %s1578_s16 = scalar_lea.vmem %s1577_s20, 16384  ;;  %p1579_p10 = scmp.lt.s32.totalorder %s292_s8, %s1577_s20 }
  0x57   : > { %p1574_p5 = pnand %p1572_p4, %p1560_p2  ;;  %p1580_p12 = scmp.lt.s32.totalorder %s1578_s16, %s1571_s4 }
  0x59   : > { %p1575_p9 = pneg %p1574_p5  ;;  %p1581_p6 = por %p1580_p12, %p1579_p10 }
  0x5b   : > { %p1582_p0 = pnand %p1581_p6, %p1575_p9 }
  0x5d   : > { %1585 = shalt.err (!%p1582_p0)
}
  0x5e   : > { %s1743_s1 = smov 128   ;;  %s1744_s26 = smov 8  }
  0x5f   : > { %1278 = dma.hbm_to_vmem [thread:$0]  (!%p1954_p11), %s290_s13, 8192, %s292_s8, %s1958_s10, %s1743_s1, %s1743_s1, %s1744_s26  }
  0x60   : > { %303 = sbr.rel (%p1970_p3) target bundleno = 793 (0x319), region = 44 }
  0x65   : > { %s305_s6 = sand.u32 1, %s1714_s29  }
  0x66   : > { %s1183_s15 = sshll.u32 %s305_s6, 5  ;;  %s306_s23 = scalar_lea.sflag [#allocation6], %s305_s6 }
  0x67   : > { %s1998_s14 = scalar_lea.vmem [#allocation5], %s1183_s15 }
  0x68   : > { %1669 = dma.done.wait (%p1881_p8), %s306_s23, 512  }
  0x69   : > { %1671 = vsyncadd (%p1881_p8), %s306_s23, 4294966784  ;;  %s314_s5 = sand.u32 1, %s1855_s12   ;;  %s2005_s10 = scalar_lea.vmem [#allocation8], %s1183_s15 }
  0x6a   : > { %s315_s18 = scalar_lea.sflag [#allocation9], %s314_s5 }
  0x6b   : > { %1673 = dma.done.wait (%p1881_p8), %s315_s18, 512  }
  0x6c   : > { %1675 = vsyncadd (%p1881_p8), %s315_s18, 4294966784  ;;  %s325_s25 = sand.u32 1, %s1702_s27  }
  0x6d   : > { %s1185_s21 = sshll.u32 %s325_s25, 9 }
  0x6e   : > { %s2012_s13 = scalar_lea.vmem [#allocation10], %s1185_s21 }
  0x6f   : > { %1677 = dma.done.wait (%p1906_p13), %s315_s18, 8192  }
  0x70   : > { %1679 = vsyncadd (%p1906_p13), %s315_s18, 4294959104  ;;  %s363_s12 = sand.u32 1, %s1690_s24   ;;  %p1187_p8 = scmp.ne.s32.totalorder %s1722_s7, 0 }
  0x71   : > { %s2021_s22 = sshll.u32 %s363_s12, 3 }
  0x72   : > { %s365_s19 = scalar_lea.vmem [#allocation11], %s2021_s22  ;;  %372 = sbr.rel (%p1187_p8) target bundleno = 122 (0x7a), region = 60 }
  0x77   : > { %v1745_v1 = vmov 0.0  }
  0x78   : > { %373 = vst [vmem:[#allocation2] sm:$0xff] %v1745_v1  ;;  %374 = vst [vmem:[#allocation2 + $0x8] sm:$0xff] %v1745_v1 }
  0x79   : > { %375 = vst [vmem:[#allocation3 + $0x8] sm:$0xff] %v1745_v1  ;;  %376 = vst [vmem:[#allocation3] sm:$0xff] %v1745_v1 }
  0x7a PF: > { %v2026_v2 = vld [vmem:[%s2012_s13 + $0x74] ss:$8 sps:$4 sm:$0xff]   ;;  %v2033_v4 = vld [vmem:[%s2012_s13 + $0x70] ss:$8 sps:$4 sm:$0xff]   ;;  %v2040_v6 = vld [vmem:[%s2012_s13 + $0x64] ss:$8 sps:$4 sm:$0xff]  }
  0x7b   : > { %v2029_v3 = vld [vmem:[%s2012_s13 + $0x174] ss:$8 sps:$4 sm:$0xff]   ;;  %779 = vmatprep.subr.bf16.mxu0 %v2026_v2  ;;  %v2036_v5 = vld [vmem:[%s2012_s13 + $0x170] ss:$8 sps:$4 sm:$0xff]   ;;  %v2045_v7 = vld [vmem:[%s2012_s13 + $0x164] ss:$8 sps:$4 sm:$0xff]  }
  0x7c   : > { %820 = vmatprep.subr.bf16.mxu1 %v2029_v3  ;;  %780 = vmatpush1.bf16.msra.mxu0 %v2033_v4  ;;  %v2048_v8 = vld [vmem:[%s2012_s13 + $0x60] ss:$8 sps:$4 sm:$0xff]   ;;  %v2056_v10 = vld [vmem:[%s2012_s13 + $0x54] ss:$8 sps:$4 sm:$0xff]   ;;  %v2062_v12 = vld [vmem:[%s2012_s13 + $0x50] ss:$8 sps:$4 sm:$0xff]  }
  0x7d   : > { %821 = vmatpush1.bf16.msra.mxu1 %v2036_v5  ;;  %781 = vmatprep.subr.bf16.mxu0 %v2040_v6  ;;  %v2052_v9 = vld [vmem:[%s2012_s13 + $0x160] ss:$8 sps:$4 sm:$0xff]   ;;  %v2059_v11 = vld [vmem:[%s2012_s13 + $0x154] ss:$8 sps:$4 sm:$0xff]   ;;  %v2065_v13 = vld [vmem:[%s2012_s13 + $0x150] ss:$8 sps:$4 sm:$0xff]  }
  0x7e   : > { %822 = vmatprep.subr.bf16.mxu1 %v2045_v7  ;;  %v2070_v14 = vld [vmem:[%s2012_s13 + $0x44] ss:$8 sps:$4 sm:$0xff]   ;;  %v2078_v16 = vld [vmem:[%s2012_s13 + $0x40] ss:$8 sps:$4 sm:$0xff]   ;;  %v2086_v18 = vld [vmem:[%s2012_s13 + $0x34] ss:$8 sps:$4 sm:$0xff]  }
  0x7f   : > { %v2075_v15 = vld [vmem:[%s2012_s13 + $0x144] ss:$8 sps:$4 sm:$0xff]   ;;  %v2083_v17 = vld [vmem:[%s2012_s13 + $0x140] ss:$8 sps:$4 sm:$0xff]   ;;  %v2091_v19 = vld [vmem:[%s2012_s13 + $0x134] ss:$8 sps:$4 sm:$0xff]  }
  0x80   : > { %782 = vmatpush1.bf16.msra.mxu0 %v2048_v8  ;;  %v2094_v20 = vld [vmem:[%s2012_s13 + $0x30] ss:$8 sps:$4 sm:$0xff]   ;;  %v2102_v22 = vld [vmem:[%s2012_s13 + $0x24] ss:$8 sps:$4 sm:$0xff]   ;;  %v2110_v24 = vld [vmem:[%s2012_s13 + $0x20] ss:$8 sps:$4 sm:$0xff]  }
  0x81   : > { %823 = vmatpush1.bf16.msra.mxu1 %v2052_v9  ;;  %783 = vmatprep.subr.bf16.mxu0 %v2056_v10  ;;  %v2097_v21 = vld [vmem:[%s2012_s13 + $0x130] ss:$8 sps:$4 sm:$0xff]   ;;  %v2107_v23 = vld [vmem:[%s2012_s13 + $0x124] ss:$8 sps:$4 sm:$0xff]   ;;  %v2115_v25 = vld [vmem:[%s2012_s13 + $0x120] ss:$8 sps:$4 sm:$0xff]  }
  0x82   : > { %824 = vmatprep.subr.bf16.mxu1 %v2059_v11  ;;  %v2118_v26 = vld [vmem:[%s2012_s13 + $0x14] ss:$8 sps:$4 sm:$0xff]   ;;  %v2126_v28 = vld [vmem:[%s2012_s13 + $0x10] ss:$8 sps:$4 sm:$0xff]   ;;  %v2134_v30 = vld [vmem:[%s2012_s13 + $0x4] ss:$8 sps:$4 sm:$0xff]  }
  0x83   : > { %v2123_v27 = vld [vmem:[%s2012_s13 + $0x114] ss:$8 sps:$4 sm:$0xff]   ;;  %v2129_v29 = vld [vmem:[%s2012_s13 + $0x110] ss:$8 sps:$4 sm:$0xff]   ;;  %v2139_v31 = vld [vmem:[%s2012_s13 + $0x104] ss:$8 sps:$4 sm:$0xff]  }
  0x84   : > { %784 = vmatpush1.bf16.msra.mxu0 %v2062_v12  ;;  %v2142_v32 = vld [vmem:[%s2012_s13] ss:$8 sps:$4 sm:$0xff]   ;;  %v2150_v34 = vld [vmem:[%s2012_s13 + $0xf4] ss:$8 sps:$4 sm:$0xff]   ;;  %v2158_v36 = vld [vmem:[%s2012_s13 + $0xf0] ss:$8 sps:$4 sm:$0xff]  }
  0x85   : > { %825 = vmatpush1.bf16.msra.mxu1 %v2065_v13  ;;  %785 = vmatprep.subr.bf16.mxu0 %v2070_v14  ;;  %v2147_v33 = vld [vmem:[%s2012_s13 + $0x100] ss:$8 sps:$4 sm:$0xff]   ;;  %v2155_v35 = vld [vmem:[%s2012_s13 + $0x1f4] ss:$8 sps:$4 sm:$0xff]   ;;  %v2161_v37 = vld [vmem:[%s2012_s13 + $0x1f0] ss:$8 sps:$4 sm:$0xff]  }
  0x86   : > { %826 = vmatprep.subr.bf16.mxu1 %v2075_v15  ;;  %v2166_v38 = vld [vmem:[%s2012_s13 + $0xe4] ss:$8 sps:$4 sm:$0xff]   ;;  %v2174_v40 = vld [vmem:[%s2012_s13 + $0xe0] ss:$8 sps:$4 sm:$0xff]   ;;  %v2182_v42 = vld [vmem:[%s2012_s13 + $0xd4] ss:$8 sps:$4 sm:$0xff]  }
  0x87   : > { %v2171_v39 = vld [vmem:[%s2012_s13 + $0x1e4] ss:$8 sps:$4 sm:$0xff]   ;;  %v2179_v41 = vld [vmem:[%s2012_s13 + $0x1e0] ss:$8 sps:$4 sm:$0xff]   ;;  %v2187_v43 = vld [vmem:[%s2012_s13 + $0x1d4] ss:$8 sps:$4 sm:$0xff]  }
  0x88   : > { %786 = vmatpush1.bf16.msra.mxu0 %v2078_v16  ;;  %v2190_v44 = vld [vmem:[%s2012_s13 + $0xd0] ss:$8 sps:$4 sm:$0xff]   ;;  %v2198_v46 = vld [vmem:[%s2012_s13 + $0xc4] ss:$8 sps:$4 sm:$0xff]   ;;  %v2210_v51 = vld [vmem:[%s2012_s13 + $0xc0] ss:$8 sps:$4 sm:$0xff]  }
  0x89   : > { %827 = vmatpush1.bf16.msra.mxu1 %v2083_v17  ;;  %787 = vmatprep.subr.bf16.mxu0 %v2086_v18  ;;  %v2193_v45 = vld [vmem:[%s2012_s13 + $0x1d0] ss:$8 sps:$4 sm:$0xff]   ;;  %v2203_v47 = vld [vmem:[%s2012_s13 + $0x1c4] ss:$8 sps:$4 sm:$0xff]   ;;  %v2213_v52 = vld [vmem:[%s2012_s13 + $0x1c0] ss:$8 sps:$4 sm:$0xff]  }
  0x8a   : > { %828 = vmatprep.subr.bf16.mxu1 %v2091_v19  ;;  %v442_v48 = vld [vmem:[%s1998_s14 + $0x8] sm:$0xff]  ;;  %v444_v50 = vld [vmem:[%s1998_s14 + $0x18] sm:$0xff]  ;;  %p1252_p13 = scmp.ne.s32.totalorder %s1722_s7, 1 }
  0x8b   : > { %v446_v49 = vpack.c.bf16 %v442_v48, %v442_v48  ;;  %v448_v53 = vpack.c.bf16 %v444_v50, %v444_v50  ;;  %v2218_v54 = vld [vmem:[%s2012_s13 + $0xb4] ss:$8 sps:$4 sm:$0xff]   ;;  %v2226_v56 = vld [vmem:[%s2012_s13 + $0xb0] ss:$8 sps:$4 sm:$0xff]   ;;  %v2234_v58 = vld [vmem:[%s2012_s13 + $0xa4] ss:$8 sps:$4 sm:$0xff]  }
  0x8c   : > { %788 = vmatpush1.bf16.msra.mxu0 %v2094_v20  ;;  %v2221_v55 = vld [vmem:[%s2012_s13 + $0x1b4] ss:$8 sps:$4 sm:$0xff]   ;;  %v2229_v57 = vld [vmem:[%s2012_s13 + $0x1b0] ss:$8 sps:$4 sm:$0xff]   ;;  %2490 = vst [vmem:[#allocation28_spill] sm:$0xff] %v2234_v58  ;;  %s2506_s11 = sld [smem:[#allocation37_spill]] (!%p1252_p13) }
  0x8d   : > { %829 = vmatpush1.bf16.msra.mxu1 %v2097_v21  ;;  %789 = vmatprep.subr.bf16.mxu0 %v2102_v22  ;;  %v2237_v59 = vld [vmem:[%s2012_s13 + $0x1a4] ss:$8 sps:$4 sm:$0xff]   ;;  %v2242_v60 = vld [vmem:[%s2012_s13 + $0xa0] ss:$8 sps:$4 sm:$0xff]   ;;  %v2250_v62 = vld [vmem:[%s2012_s13 + $0x94] ss:$8 sps:$4 sm:$0xff]  }
  0x8e   : > { %830 = vmatprep.subr.bf16.mxu1 %v2107_v23  ;;  %811 = vmatprep.mubr.bf16.mxu0 %v446_v49  ;;  %2491 = vst [vmem:[#allocation29_spill] sm:$0xff] %v2237_v59  ;;  %2492 = vst [vmem:[#allocation30_spill] sm:$0xff] %v2242_v60  ;;  %v2245_v61 = vld [vmem:[%s2012_s13 + $0x1a0] ss:$8 sps:$4 sm:$0xff]   ;;  %v2253_v63 = vld [vmem:[%s2012_s13 + $0x194] ss:$8 sps:$4 sm:$0xff]  }
  0x8f   : > { %852 = vmatprep.mubr.bf16.mxu1 %v448_v53  ;;  %2493 = vst [vmem:[#allocation31_spill] sm:$0xff] %v2245_v61  ;;  %2494 = vst [vmem:[#allocation32_spill] sm:$0xff] %v2250_v62  ;;  %v2258_v0 = vld [vmem:[%s2012_s13 + $0x90] ss:$8 sps:$4 sm:$0xff]   ;;  %v2266_v48 = vld [vmem:[%s2012_s13 + $0x84] ss:$8 sps:$4 sm:$0xff]  }
  0x90   : > { %790 = vmatpush1.bf16.msra.mxu0 %v2110_v24  ;;  %2495 = vst [vmem:[#allocation33_spill] sm:$0xff] %v2253_v63  ;;  %2496 = vst [vmem:[#allocation34_spill] sm:$0xff] %v2258_v0  ;;  %v2261_v1 = vld [vmem:[%s2012_s13 + $0x190] ss:$8 sps:$4 sm:$0xff]   ;;  %v2269_v49 = vld [vmem:[%s2012_s13 + $0x184] ss:$8 sps:$4 sm:$0xff]  }
  0x91   : > { %831 = vmatpush1.bf16.msra.mxu1 %v2115_v25  ;;  %791 = vmatprep.subr.bf16.mxu0 %v2118_v26  ;;  %2497 = vst [vmem:[#allocation35_spill] sm:$0xff] %v2261_v1  ;;  %v2272_v50 = vld [vmem:[%s2012_s13 + $0x80] ss:$8 sps:$4 sm:$0xff]  }
  0x92   : > { %832 = vmatprep.subr.bf16.mxu1 %v2123_v27  ;;  %v2277_v53 = vld [vmem:[%s2012_s13 + $0x180] ss:$8 sps:$4 sm:$0xff]  }
  0x94   : > { %792 = vmatpush1.bf16.msra.mxu0 %v2126_v28 }
  0x95   : > { %833 = vmatpush1.bf16.msra.mxu1 %v2129_v29  ;;  %793 = vmatprep.subr.bf16.mxu0 %v2134_v30 }
  0x96   : > { %834 = vmatprep.subr.bf16.mxu1 %v2139_v31 }
  0x98   : > { %794 = vmatpush1.bf16.msra.mxu0 %v2142_v32 }
  0x99   : > { %835 = vmatpush1.bf16.msra.mxu1 %v2147_v33  ;;  %795 = vmatprep.subr.bf16.mxu0 %v2150_v34 }
  0x9a   : > { %836 = vmatprep.subr.bf16.mxu1 %v2155_v35 }
  0x9c   : > { %796 = vmatpush2.bf16.msra.mxu0 %v2158_v36 }
  0x9d   : > { %837 = vmatpush2.bf16.msra.mxu1 %v2161_v37  ;;  %797 = vmatprep.subr.bf16.mxu0 %v2166_v38 }
  0x9e   : > { %838 = vmatprep.subr.bf16.mxu1 %v2171_v39 }
  0xa0   : > { %798 = vmatpush2.bf16.msra.mxu0 %v2174_v40 }
  0xa1   : > { %839 = vmatpush2.bf16.msra.mxu1 %v2179_v41  ;;  %799 = vmatprep.subr.bf16.mxu0 %v2182_v42 }
  0xa2   : > { %840 = vmatprep.subr.bf16.mxu1 %v2187_v43 }
  0xa4   : > { %800 = vmatpush2.bf16.msra.mxu0 %v2190_v44 }
  0xa5   : > { %841 = vmatpush2.bf16.msra.mxu1 %v2193_v45  ;;  %801 = vmatprep.subr.bf16.mxu0 %v2198_v46 }
  0xa6   : > { %842 = vmatprep.subr.bf16.mxu1 %v2203_v47 }
  0xa8   : > { %802 = vmatpush2.bf16.msra.mxu0 %v2210_v51 }
  0xa9   : > { %843 = vmatpush2.bf16.msra.mxu1 %v2213_v52  ;;  %803 = vmatprep.subr.bf16.mxu0 %v2218_v54 }
  0xaa   : > { %844 = vmatprep.subr.bf16.mxu1 %v2221_v55 }
  0xac   : > { %804 = vmatpush2.bf16.msra.mxu0 %v2226_v56 }
  0xad   : > { %845 = vmatpush2.bf16.msra.mxu1 %v2229_v57  ;;  %805 = vmatprep.subr.bf16.mxu0 %v2234_v58  ;;  %v452_v58 = vld [vmem:[%s2005_s10 + $0x18] sm:$0xff] }
  0xae   : > { %846 = vmatprep.subr.bf16.mxu1 %v2237_v59  ;;  %v450_v59 = vld [vmem:[%s2005_s10 + $0x8] sm:$0xff] }
  0xb0   : > { %806 = vmatpush2.bf16.msra.mxu0 %v2242_v60  ;;  %v443_v60 = vld [vmem:[%s1998_s14 + $0x10] sm:$0xff] }
  0xb1   : > { %847 = vmatpush2.bf16.msra.mxu1 %v2245_v61  ;;  %807 = vmatprep.subr.bf16.mxu0 %v2250_v62  ;;  %v441_v61 = vld [vmem:[%s1998_s14] sm:$0xff] }
  0xb2   : > { %848 = vmatprep.subr.bf16.mxu1 %v2253_v63  ;;  %v445_v62 = vpack.c.bf16 %v441_v61, %v441_v61  ;;  %v447_v63 = vpack.c.bf16 %v443_v60, %v443_v60 }
  0xb4   : > { %808 = vmatpush2.bf16.msra.mxu0 %v2258_v0  ;;  %v456_v0 = vpack.c.bf16 %v452_v58, %v452_v58 }
  0xb5   : > { %849 = vmatpush2.bf16.msra.mxu1 %v2261_v1  ;;  %809 = vmatprep.subr.bf16.mxu0 %v2266_v48  ;;  %v454_v1 = vpack.c.bf16 %v450_v59, %v450_v59 }
  0xb6   : > { %850 = vmatprep.subr.bf16.mxu1 %v2269_v49 }
  0xb8   : > { %810 = vmatpush2.bf16.msra.mxu0 %v2272_v50 }
  0xb9   : > { %851 = vmatpush2.bf16.msra.mxu1 %v2277_v53  ;;  %867 = vmatprep.subr.bf16.mxu0 %v2026_v2  ;;  %v2498_v2 = vld [vmem:[#allocation28_spill] sm:$0xff] }
  0xba   : > { %908 = vmatprep.subr.bf16.mxu1 %v2029_v3  ;;  %v2499_v3 = vld [vmem:[#allocation29_spill] sm:$0xff] }
  0xbb   : > { %812 = vmatmul.mubr.bf16.vlgmr.msra.gmra.mxu0 %v445_v62 }
  0xbc   : > { %853 = vmatmul.mubr.bf16.vlgmr.msra.gmra.mxu1 %v447_v63  ;;  %868 = vmatpush1.bf16.msra.mxu0 %v2033_v4  ;;  %v2500_v4 = vld [vmem:[#allocation30_spill] sm:$0xff] }
  0xbd   : > { %909 = vmatpush1.bf16.msra.mxu1 %v2036_v5  ;;  %869 = vmatprep.subr.bf16.mxu0 %v2040_v6  ;;  %v2501_v5 = vld [vmem:[#allocation31_spill] sm:$0xff]  ;;  %v2502_v6 = vld [vmem:[#allocation32_spill] sm:$0xff] }
  0xbe   : > { %910 = vmatprep.subr.bf16.mxu1 %v2045_v7  ;;  %899 = vmatprep.mubr.bf16.mxu0 %v454_v1  ;;  %v2503_v7 = vld [vmem:[#allocation33_spill] sm:$0xff] }
  0xbf   : > { %940 = vmatprep.mubr.bf16.mxu1 %v456_v0 }
  0xc0   : > { %870 = vmatpush1.bf16.msra.mxu0 %v2048_v8  ;;  %v2504_v8 = vld [vmem:[#allocation34_spill] sm:$0xff] }
  0xc1   : > { %911 = vmatpush1.bf16.msra.mxu1 %v2052_v9  ;;  %871 = vmatprep.subr.bf16.mxu0 %v2056_v10  ;;  %v2505_v9 = vld [vmem:[#allocation35_spill] sm:$0xff]  ;;  %v449_v10 = vld [vmem:[%s2005_s10] sm:$0xff] }
  0xc2   : > { %912 = vmatprep.subr.bf16.mxu1 %v2059_v11  ;;  %v451_v11 = vld [vmem:[%s2005_s10 + $0x10] sm:$0xff] }
  0xc4   : > { %872 = vmatpush1.bf16.msra.mxu0 %v2062_v12  ;;  %v453_v12 = vpack.c.bf16 %v449_v10, %v449_v10 }
  0xc5   : > { %913 = vmatpush1.bf16.msra.mxu1 %v2065_v13  ;;  %873 = vmatprep.subr.bf16.mxu0 %v2070_v14  ;;  %v455_v13 = vpack.c.bf16 %v451_v11, %v451_v11 }
  0xc6   : > { %914 = vmatprep.subr.bf16.mxu1 %v2075_v15  ;;  %v457_v15 = vld [vmem:[#allocation2] sm:$0xff] }
  0xc8   : > { %874 = vmatpush1.bf16.msra.mxu0 %v2078_v16 }
  0xc9   : > { %915 = vmatpush1.bf16.msra.mxu1 %v2083_v17  ;;  %875 = vmatprep.subr.bf16.mxu0 %v2086_v18 }
  0xca   : > { %916 = vmatprep.subr.bf16.mxu1 %v2091_v19  ;;  %v458_v19 = vld [vmem:[#allocation2 + $0x8] sm:$0xff] }
  0xcc   : > { %876 = vmatpush1.bf16.msra.mxu0 %v2094_v20 }
  0xcd   : > { %917 = vmatpush1.bf16.msra.mxu1 %v2097_v21  ;;  %877 = vmatprep.subr.bf16.mxu0 %v2102_v22 }
  0xce   : > { %918 = vmatprep.subr.bf16.mxu1 %v2107_v23 }
  0xd0   : > { %878 = vmatpush1.bf16.msra.mxu0 %v2110_v24 }
  0xd1   : > { %919 = vmatpush1.bf16.msra.mxu1 %v2115_v25  ;;  %879 = vmatprep.subr.bf16.mxu0 %v2118_v26 }
  0xd2   : > { %920 = vmatprep.subr.bf16.mxu1 %v2123_v27 }
  0xd4   : > { %880 = vmatpush1.bf16.msra.mxu0 %v2126_v28 }
  0xd5   : > { %921 = vmatpush1.bf16.msra.mxu1 %v2129_v29  ;;  %881 = vmatprep.subr.bf16.mxu0 %v2134_v30  ;;  %v865_v29 = vld [vmem:[#allocation3 + $0x8] sm:$0xff] }
  0xd6   : > { %922 = vmatprep.subr.bf16.mxu1 %v2139_v31 }
  0xd8   : > { %882 = vmatpush1.bf16.msra.mxu0 %v2142_v32 }
  0xd9   : > { %923 = vmatpush1.bf16.msra.mxu1 %v2147_v33  ;;  %883 = vmatprep.subr.bf16.mxu0 %v2150_v34  ;;  %v866_v33 = vld [vmem:[#allocation3] sm:$0xff] }
  0xda   : > { %924 = vmatprep.subr.bf16.mxu1 %v2155_v35 }
  0xdc   : > { %884 = vmatpush2.bf16.msra.mxu0 %v2158_v36 }
  0xdd   : > { %925 = vmatpush2.bf16.msra.mxu1 %v2161_v37  ;;  %885 = vmatprep.subr.bf16.mxu0 %v2166_v38 }
  0xde   : > { %926 = vmatprep.subr.bf16.mxu1 %v2171_v39 }
  0xe0   : > { %886 = vmatpush2.bf16.msra.mxu0 %v2174_v40 }
  0xe1   : > { %927 = vmatpush2.bf16.msra.mxu1 %v2179_v41  ;;  %887 = vmatprep.subr.bf16.mxu0 %v2182_v42 }
  0xe2   : > { %928 = vmatprep.subr.bf16.mxu1 %v2187_v43 }
  0xe4   : > { %888 = vmatpush2.bf16.msra.mxu0 %v2190_v44 }
  0xe5   : > { %929 = vmatpush2.bf16.msra.mxu1 %v2193_v45  ;;  %889 = vmatprep.subr.bf16.mxu0 %v2198_v46 }
  0xe6   : > { %930 = vmatprep.subr.bf16.mxu1 %v2203_v47 }
  0xe8   : > { %890 = vmatpush2.bf16.msra.mxu0 %v2210_v51 }
  0xe9   : > { %931 = vmatpush2.bf16.msra.mxu1 %v2213_v52  ;;  %891 = vmatprep.subr.bf16.mxu0 %v2218_v54 }
  0xea   : > { %932 = vmatprep.subr.bf16.mxu1 %v2221_v55 }
  0xec   : > { %892 = vmatpush2.bf16.msra.mxu0 %v2226_v56 }
  0xed   : > { %933 = vmatpush2.bf16.msra.mxu1 %v2229_v57  ;;  %893 = vmatprep.subr.bf16.mxu0 %v2498_v2 }
  0xee   : > { %934 = vmatprep.subr.bf16.mxu1 %v2499_v3 }
  0xf0   : > { %894 = vmatpush2.bf16.msra.mxu0 %v2500_v4 }
  0xf1   : > { %935 = vmatpush2.bf16.msra.mxu1 %v2501_v5  ;;  %895 = vmatprep.subr.bf16.mxu0 %v2502_v6 }
  0xf2   : > { %936 = vmatprep.subr.bf16.mxu1 %v2503_v7 }
  0xf4   : > { %896 = vmatpush2.bf16.msra.mxu0 %v2504_v8 }
  0xf5   : > { %937 = vmatpush2.bf16.msra.mxu1 %v2505_v9  ;;  %897 = vmatprep.subr.bf16.mxu0 %v2266_v48 }
  0xf6   : > { %938 = vmatprep.subr.bf16.mxu1 %v2269_v49 }
  0xf8   : > { %898 = vmatpush2.bf16.msra.mxu0 %v2272_v50 }
  0xf9   : > { %939 = vmatpush2.bf16.msra.mxu1 %v2277_v53 }
  0xfb   : > { %900 = vmatmul.mubr.bf16.vlgmr.msra.gmra.mxu0 %v453_v12 }
  0xfc   : > { %941 = vmatmul.mubr.bf16.vlgmr.msra.gmra.mxu1 %v455_v13 }
 0x17b   : > { %v813_v14 = vpop.f32.mrf.mxu0 }
 0x17c   : > { %v854_v16 = vpop.f32.mrf.mxu1 }
 0x17d   : > { %v855_v17 = vadd.f32 %v854_v16, %v813_v14  ;;  %v815_v18 = vpop.f32.mrf.mxu0 }
 0x17e   : > { %v856_v20 = vpop.f32.mrf.mxu1 }
 0x17f   : > { %v861_v21 = vadd.f32 %v855_v17, %v457_v15  ;;  %v857_v22 = vadd.f32 %v856_v20, %v815_v18  ;;  %v817_v23 = vpop.f32.mrf.mxu0 }
 0x180   : > { %v858_v24 = vpop.f32.mrf.mxu1 }
 0x181   : > { %863 = vst [vmem:[#allocation2] sm:$0xff] %v861_v21  ;;  %v862_v25 = vadd.f32 %v857_v22, %v458_v19  ;;  %v818_v26 = vpop.f32.mrf.mxu0 }
 0x182   : > { %v859_v27 = vpop.f32.mrf.mxu1 }
 0x183   : > { %864 = vst [vmem:[#allocation2 + $0x8] sm:$0xff] %v862_v25 }
 0x1bb   : > { %v901_v28 = vpop.f32.mrf.mxu0 }
 0x1bc   : > { %v942_v30 = vpop.f32.mrf.mxu1 }
 0x1bd   : > { %v943_v31 = vadd.f32 %v942_v30, %v901_v28  ;;  %v903_v32 = vpop.f32.mrf.mxu0 }
 0x1be   : > { %v944_v34 = vpop.f32.mrf.mxu1 }
 0x1bf   : > { %v949_v35 = vadd.f32 %v943_v31, %v865_v29  ;;  %v945_v36 = vadd.f32 %v944_v34, %v903_v32  ;;  %v905_v37 = vpop.f32.mrf.mxu0  ;;  %956 = sbr.rel (%p1252_p13) target bundleno = 769 (0x301), region = 64 }
 0x1c0   : > { %v946_v38 = vpop.f32.mrf.mxu1 }
 0x1c1   : > { %951 = vst [vmem:[#allocation3 + $0x8] sm:$0xff] %v949_v35  ;;  %v950_v39 = vadd.f32 %v945_v36, %v866_v33  ;;  %v906_v40 = vpop.f32.mrf.mxu0 }
 0x1c2   : > { %v947_v41 = vpop.f32.mrf.mxu1 }
 0x1c3   : > { %952 = vst [vmem:[#allocation3] sm:$0xff] %v950_v39 }
 0x1c4   : > { %v961_v42 = vlaneseq  ;;  %v957_v44 = vld [vmem:[%s2437_s3] sm:$0x3]  ;;  %v959_v51 = vld [vmem:[#allocation2 + $0x8] sm:$0xff]  ;;  %v1746_v7 = vmov 0  }
 0x1c5   : > { %v958_v45 = vld [vmem:[#allocation2] sm:$0xff]  ;;  %1497 = vset.pattern.permute.xlu0 %v1746_v7 }
 0x1c6   : > { %v962_v43 = vshrl.u32 %v961_v42, 7  ;;  %v985_v61 = vld [vmem:[%s2506_s11] sm:$0x3] }
 0x1c7   : > { %v1253_v8 = vld [vmem:[#allocation4] ss:$0 sm:$0xff] }
 0x1c8   : > { %v963_v46 = vsub.s32 0, %v962_v43  ;;  %v967_v47 = vsub.s32 1, %v962_v43  ;;  %v975_v52 = vld [vmem:[#allocation3 + $0x8] sm:$0xff] }
 0x1ca   : > { %v976_v54 = vld [vmem:[#allocation3] sm:$0xff]  ;;  %v964_v55 = vrot.slane %v957_v44, %v963_v46  ;;  %v968_v56 = vrot.slane %v957_v44, %v967_v47  ;;  %v990_v50 = vrot.slane %v985_v61, %v963_v46  ;;  %v994_v53 = vrot.slane %v985_v61, %v967_v47 }
 0x1cc   : > { %v971_v57 = vadd.f32 %v964_v55, %v958_v45  ;;  %v972_v58 = vadd.f32 %v968_v56, %v959_v51  ;;  %v977_v59 = vadd.f32 %v975_v52, %v964_v55  ;;  %v978_v60 = vadd.f32 %v976_v54, %v968_v56 }
 0x1ce   : > { %v973_v62 = vmax.f32 %v971_v57, 0.0  ;;  %v974_v63 = vmax.f32 %v972_v58, 0.0  ;;  %v979_v0 = vmax.f32 %v977_v59, 0.0  ;;  %v980_v1 = vmax.f32 %v978_v60, 0.0 }
 0x1d0   : > { %v981_v48 = vsub.f32 %v973_v62, %v979_v0  ;;  %v982_v49 = vsub.f32 %v974_v63, %v980_v1 }
 0x1d2   : > { %v983_v2 = vmul.f32 %v981_v48, %v981_v48  ;;  %v984_v3 = vmul.f32 %v982_v49, %v982_v49 }
 0x1d4   : > { %v997_v4 = vmul.f32 %v990_v50, %v983_v2  ;;  %v998_v5 = vmul.f32 %v994_v53, %v984_v3 }
 0x1d6   : > { %v999_v6 = vadd.f32 %v998_v5, %v997_v4 }
 0x1d8   : > { %1000 = vadd.xlane.f32.xlu0 %v999_v6 }
 0x261   : > { %v1001_v9 = vpop.xlane.xlu0 %1000 }
 0x262   : > { %v1009_v10 = vadd.f32 %v1253_v8, %v1001_v9 }
 0x264   : > { %v1254_v11 = vmul.f32 -1.442695, %v1009_v10 }
 0x266   : > { %1498 = vpow2.f32 %v1254_v11 }
 0x273   : > { %v1499_v12 = vpop.eup %1498 }
 0x274   : > { %v1013_v13 = vadd.f32 1.0, %v1499_v12 }
 0x276   : > { %1500 = vrcp.f32 %v1013_v13 }
 0x283   : > { %v1501_v14 = vpop.eup %1500 }
 0x284   : > { %1018 = vperm.xlu0 %1497, %v1501_v14  }
 0x2ff   : > { %v1019_v15 = vpop.permute.xlu0 %1018 }
 0x300   : > { %1021 = vst [vmem:[%s365_s19] sm:$0xff] %v1019_v15 }
 0x301 PF: > { %s2507_s20 = sld [smem:[#allocation18_spill]]  ;;  %s1036_s14 = sshll.u32 %s365_s19, 4  ;;  %s1037_s14 = int_to_ptr.vmem [resolvable:$true] %s1036_s14 }
 0x302   : > { %s2509_s15 = sld [smem:[#allocation38_spill]]  ;;  %s1023_s5 = scalar_lea.sflag [#allocation7], %s363_s12 }
 0x303   : > { %s1586_s18 = scalar_lea.vmem %s1037_s14, 128  ;;  %s1747_s10 = smov [#allocation11]  }
 0x304   : > { %p1587_p11 = scmp.ne.s32.totalorder %s1037_s14, %s1586_s18  ;;  %s1590_s25 = sshll.u32 %s1747_s10, 4  ;;  %s1591_s25 = int_to_ptr.vmem [resolvable:$false] %s1590_s25 }
 0x305   : > { %s1592_s21 = scalar_lea.vmem %s1591_s25, 256  ;;  %p1593_p2 = scmp.lt.s32.totalorder %s1037_s14, %s1591_s25 }
 0x306   : > { %p1588_p3 = pnand %p1587_p11, %p1921_p7  ;;  %p1594_p4 = scmp.lt.s32.totalorder %s1592_s21, %s1586_s18 }
 0x307   : > { %s1256_s1 = sshll.u32 %s2507_s20, 7 }
 0x308   : > { %s1034_s23 = scalar_lea.hbm %s2509_s15, %s1256_s1  ;;  %p1589_p1 = pneg %p1588_p3 }
 0x309   : > { %p1595_p5 = por %p1594_p4, %p1593_p2 }
 0x30b   : > { %p1596_p9 = pnand %p1595_p5, %p1589_p1 }
 0x30d   : > { %1599 = shalt.err (!%p1596_p9)
}
 0x30e   : > { %s1600_s13 = scalar_lea.hbm %s1034_s23, 128  ;;  %s1604_s19 = scalar_lea.hbm %s2509_s15, 256 }
 0x30f   : > { %p1601_p10 = scmp.ne.s32.totalorder %s1034_s23, %s1600_s13  ;;  %p1605_p0 = scmp.lt.s32.totalorder %s1034_s23, %s2509_s15 }
 0x310   : > { %p1606_p8 = scmp.lt.s32.totalorder %s1604_s19, %s1600_s13 }
 0x311   : > { %p1602_p12 = pnand %p1601_p10, %p1921_p7 }
 0x312   : > { %p1607_p13 = por %p1606_p8, %p1605_p0 }
 0x313   : > { %p1603_p6 = pneg %p1602_p12 }
 0x315   : > { %p1608_p11 = pnand %p1607_p13, %p1603_p6 }
 0x317   : > { %1611 = shalt.err (!%p1608_p11)
}
 0x318   : > { %1267 = dma.vmem_to_hbm [thread:$0]  (%p1921_p7), %s1037_s14, 128, %s1034_s23, %s1023_s5  }
 0x319 PF: > { %s2510_s7 = sld [smem:[#allocation20_spill]] }
 0x31a   : > { %s2511_s4 = sld [smem:[#allocation16_spill]] }
 0x31b   : > { %s2512_s11 = sld [smem:[#allocation27_spill]] }
 0x31f   : > { %p1284_p3 = scmp.ge.s32.totalorder %s2510_s7, 2 }
 0x320   : > { %s1048_s20 = sand.u32 1, %s2511_s4  }
 0x321   : > { %p2513_p1 = scmp.ne.s32.totalorder %s2512_s11, 0  ;;  %s1049_s1 = scalar_lea.sflag [#allocation7], %s1048_s20 }
 0x323   : > { %p1280_p2 = pnand %p1284_p3, %p2513_p1 }
 0x325   : > { %p1281_p4 = pneg %p1280_p2 }
 0x327   : > { %1681 = dma.done.wait (%p1281_p4), %s1049_s1, 128  }
 0x328   : > { %1683 = vsyncadd (%p1281_p4), %s1049_s1, 4294967168  ;;  %s27_s11 = sadd.s32 1, %s2510_s7   ;;  %s2515_s16 = sld [smem:[#allocation17_spill]] }
 0x329   : > { %p2387_p5 = scmp.ge.s32.totalorder %s27_s11, 6   ;;  %s2516_s25 = sld [smem:[#allocation25_spill]] }
 0x32a   : > { %s2517_s6 = sld [smem:[#allocation23_spill]]  ;;  %s2523_s23 = smov %s1690_s24 }
 0x32b   : > { %s2518_s14 = sld [smem:[#allocation24_spill]]  ;;  %s2525_s26 = smov %s1702_s27 }
 0x32c   : > { %s2519_s8 = sld [smem:[#allocation19_spill]]  ;;  %s2526_s27 = smov %s1706_s28 }
 0x32d   : > { %s2520_s18 = sld [smem:[#allocation21_spill]]  ;;  %s2528_s5 = smov %s1714_s29 }
 0x32e   : > { %s2521_s10 = sld [smem:[#allocation22_spill]]  ;;  %s2524_s24 = smov %s2515_s16 }
 0x32f   : > { %s2529_s29 = smov %s1718_s30  ;;  %s2531_s7 = smov %s1730_s9 }
 0x330   : > { %s2527_s28 = smov %s2517_s6  ;;  %26 = sbr.rel (!%p2387_p5) target bundleno = 16 (0x10), region = 121 }
 0x331   : > { %s2530_s30 = smov %s2518_s14 }
 0x333   : > { %s2532_s9 = smov %s2520_s18 }
 0x335   :  { %1054 = vsyncpa [#allocation6], 1 }
 0x336   :  { %1056 = vsyncpa [#allocation6 + $0x1], 1 }
 0x337   :  { %1057 = vsyncpa [#allocation9], 1 }
 0x338   :  { %1059 = vsyncpa [#allocation9 + $0x1], 1 }
 0x339   :  { %1060 = vsyncpa [#allocation7], 1 }
 0x33a   :  { %1062 = vsyncpa [#allocation7 + $0x1], 1 }

</bundles_post_ra>
